<compile_context>
chip_gen: v7x
topology: tpu7x:2x2x1
jax: 0.10.0
libtpu: 0.0.40
codegen_flags: <defaults>
</compile_context>

<pallas_src>
import functools

import jax
import jax.numpy as jnp
import numpy as np
from jax.experimental import pallas as pl
from jax.experimental.pallas import tpu as pltpu


def make_divisible(v, divisor, min_value=None):
    if min_value is None:
        min_value = divisor
    new_v = max(min_value, int(v + divisor / 2) // divisor * divisor)
    if new_v < 0.9 * v:
        new_v += divisor
    return new_v


# ---------------------------------------------------------------------------------------
# pltpu.roll rotation-convention probe (cached, one tiny compile on first use only).
# The depthwise taps need shifted[l] = h[l + s]; we probe which direction pltpu.roll
# rotates so tap alignment is correct regardless of the convention in the installed jax.
# Resolved once BEFORE jitting the forward (it requires a concrete device round-trip).
# ---------------------------------------------------------------------------------------
_ROLL_SIGN = None


def _roll_probe_kernel(x_ref, o_ref):
    o_ref[...] = pltpu.roll(x_ref[...], 1, axis=1)


def _get_roll_sign():
    global _ROLL_SIGN
    if _ROLL_SIGN is None:
        x = jax.lax.broadcasted_iota(jnp.float32, (8, 128), 1)
        y = pl.pallas_call(
            _roll_probe_kernel,
            out_shape=jax.ShapeDtypeStruct((8, 128), jnp.float32),
        )(x)
        first = int(np.asarray(y)[0, 0])
        if first == 127:      # jnp.roll convention: out[i] = in[i - shift]
            _ROLL_SIGN = -1
        elif first == 1:      # opposite convention: out[i] = in[i + shift]
            _ROLL_SIGN = 1
        else:
            raise RuntimeError(f"unexpected pltpu.roll probe value: {first}")
    return _ROLL_SIGN


# ---------------------------------------------------------------------------------------
# Fused kernel.  x_ref holds a block of images, channel-major per image:
#   x_ref: (Bblk, Cin, HW), o_ref: (Bblk, Cout, HW).  HW = H*W is lane-dense (mult. of 128).
# ---------------------------------------------------------------------------------------
def mobile_bottleneck_kernel(
    x_ref,      # (Bblk, Cin, HW)
    w1_ref,     # (Chid, Cin)    1x1 expand weight, BN1 scale folded (f32 or bf16)
    wdw_ref,    # (Chid, 9)      3x3 depthwise taps (row-major kh*3+kw), BN2 scale folded
    bhid_ref,   # (Chid, 3)      packed biases: [:,0]=BN1 bias, [:,1]=BN2 bias, [:,2]=SE fc2 bias
    wfc1_ref,   # (Cse,  Chid)   SE fc1 weight
    bfc1_ref,   # (Cse,  1)      SE fc1 bias
    wfc2_ref,   # (Chid, Cse)    SE fc2 weight
    w3_ref,     # (Cout, Chid)   1x1 project weight, BN3 scale folded (f32 or bf16)
    b3_ref,     # (Cout, 1)      BN3 bias
    o_ref,      # (Bblk, Cout, HW)
    *, H, W, roll_sign, identity,
):
    HW = H * W
    Bblk = x_ref.shape[0]
    mm_dtype = w1_ref.dtype          # MXU operand dtype (bf16 fast path or f32)

    def hswish(v):
        # exact reproduction of the module's HardSwish: x * relu(x + 3) / 6 (no clamp at 6)
        return v * (jax.nn.relu(v + 3.0) * (1.0 / 6.0))

    # ---- weights / biases pulled into locals once (shared across the image loop) ----
    w1 = w1_ref[...]
    w3 = w3_ref[...]
    wdw = wdw_ref[...]
    wdw_cols = [wdw[:, t:t + 1] for t in range(9)]           # (Chid, 1) per tap
    b1 = bhid_ref[:, 0:1]
    b2 = bhid_ref[:, 1:2]
    bse2 = bhid_ref[:, 2:3]
    wfc1 = wfc1_ref[...]
    bfc1 = bfc1_ref[...]
    wfc2 = wfc2_ref[...]
    b3 = b3_ref[...]

    # ---- per-lane boundary masks, hoisted out of the 9-tap loop AND the image loop ----
    # Pixels are flattened as l = r*W + c per image; tap (dh, dw) is a circular lane roll
    # by dh*W + dw plus a 0/1 float mask that also kills any wrap-around reads.
    lane = jax.lax.broadcasted_iota(jnp.int32, (1, HW), 1)
    col = lane % W
    row = lane // W
    row_ok = {-1: row >= 1, 0: None, 1: row < (H - 1)}
    col_ok = {-1: col >= 1, 0: None, 1: col < (W - 1)}
    tap_mask = {}
    for dh in (-1, 0, 1):
        for dw in (-1, 0, 1):
            if dh == 0 and dw == 0:
                continue
            m = row_ok[dh]
            if col_ok[dw] is not None:
                m = col_ok[dw] if m is None else (m & col_ok[dw])
            tap_mask[(dh, dw)] = m.astype(jnp.float32)        # (1, HW) 0/1

    # Global-average-pool as a small MXU matvec (keeps the XLU free for the rolls).
    pool_ones = jnp.full((HW, 1), 1.0 / HW, dtype=jnp.float32)

    # ---- phase 1: per image, 1x1 expand + hswish + 3x3 depthwise; collect SE pools ----
    h_dw = []
    pools = []
    for b in range(Bblk):
        x_b = x_ref[b]                                        # (Cin, HW)
        h = jnp.dot(w1, x_b.astype(mm_dtype),
                    preferred_element_type=jnp.float32)       # (Chid, HW)
        h = hswish(h + b1)

        acc = h * wdw_cols[4]                                 # centre tap: no roll, no mask
        for kh in range(3):
            for kw in range(3):
                dh, dw = kh - 1, kw - 1
                if dh == 0 and dw == 0:
                    continue
                s = dh * W + dw
                shifted = pltpu.roll(h, (roll_sign * s) % HW, axis=1)   # shifted[l] = h[l+s]
                acc = acc + (shifted * wdw_cols[kh * 3 + kw]) * tap_mask[(dh, dw)]
        hb = acc + b2                                         # BN2 bias
        h_dw.append(hb)
        pools.append(jnp.dot(hb, pool_ones,
                             preferred_element_type=jnp.float32))       # (Chid, 1)

    # ---- phase 2: batched Squeeze-and-Excite gate over all images in the block ----
    pool_mat = pools[0] if Bblk == 1 else jnp.concatenate(pools, axis=1)   # (Chid, Bblk)
    z = jax.nn.relu(jnp.dot(wfc1, pool_mat, preferred_element_type=jnp.float32) + bfc1)
    gates = jax.nn.sigmoid(jnp.dot(wfc2, z, preferred_element_type=jnp.float32) + bse2)

    # ---- phase 3: gate + hswish + 1x1 project (+ residual) per image ----
    for b in range(Bblk):
        hb = hswish(h_dw[b] * gates[:, b:b + 1])
        o = jnp.dot(w3, hb.astype(mm_dtype),
                    preferred_element_type=jnp.float32) + b3  # (Cout, HW)
        if identity:
            o = o + x_ref[b]          # reload x here; not held live through the block
        o_ref[b] = o.astype(o_ref.dtype)


# ---------------------------------------------------------------------------------------
# Parameter preparation (hoisted: call ONCE): fold inference-mode BN affine into the
# adjacent conv weights, lay everything out channel-major, optionally cast the 1x1-conv
# weights to bf16 for the MXU (accumulation stays f32 inside the kernel).
# ---------------------------------------------------------------------------------------
def prepare_kernel_params(p, matmul_dtype=jnp.float32):
    chid = p["w1"].shape[0]
    return {
        "w1": (p["w1"] * p["bn1_scale"][:, None]).astype(matmul_dtype),          # (Chid, Cin)
        "wdw": p["w_dw"].reshape(chid, 9) * p["bn2_scale"][:, None],             # (Chid, 9) f32
        "b_hid": jnp.stack([p["bn1_bias"], p["bn2_bias"], p["b_fc2"]], axis=1),  # (Chid, 3)
        "w_fc1": p["w_fc1"],                                                     # (Cse, Chid)
        "b_fc1": p["b_fc1"][:, None],                                            # (Cse, 1)
        "w_fc2": p["w_fc2"],                                                     # (Chid, Cse)
        "w3": (p["w3"] * p["bn3_scale"][:, None]).astype(matmul_dtype),          # (Cout, Chid)
        "b3": p["bn3_bias"][:, None],                                            # (Cout, 1)
    }


def _cost_estimate(kp, B, Cin, HW, Cout):
    chid = kp["w1"].shape[0]
    cse = kp["w_fc1"].shape[0]
    flops = (2 * chid * Cin * HW          # 1x1 expand
             + 2 * 9 * chid * HW          # 3x3 depthwise
             + 2 * chid * HW              # SE pool matvec
             + 2 * Cout * chid * HW       # 1x1 project
             + 12 * chid * HW) * B        # hswish / masks / gating elementwise
    flops += 4 * cse * chid * B           # SE fc1 + fc2
    trans = chid * B                      # sigmoid gates
    weight_bytes = sum(int(v.size) * v.dtype.itemsize for v in kp.values())
    bytes_accessed = 4 * B * (Cin + Cout) * HW + weight_bytes
    return pl.CostEstimate(flops=int(flops), transcendentals=int(trans),
                           bytes_accessed=int(bytes_accessed))


def _default_batch_block(B):
    """One image per grid step on v7x (2 TensorCores/chip -> 'parallel' batch grid);
    whole batch in a single grid step elsewhere (v5e/v6e have one TC and per-step
    grid overhead would dominate at this size)."""
    try:
        kind = jax.devices()[0].device_kind.lower()
    except Exception:
        kind = ""
    if ("v7" in kind or "tpu7" in kind) and B > 1:
        return 1
    return B


# ---------------------------------------------------------------------------------------
# Forward wrapper.  x: (B, Cin, H, W) NCHW f32 — only a metadata reshape, no transpose.
# ---------------------------------------------------------------------------------------
def mobile_bottleneck(x, kp, *, roll_sign, batch_block=None):
    B, Cin, H, W = x.shape
    HW = H * W
    Cout = kp["w3"].shape[0]
    identity = (Cin == Cout)              # stride == 1 in this kernel

    if batch_block is None:
        batch_block = B
    assert B % batch_block == 0
    nblk = B // batch_block

    x_flat = x.reshape(B, Cin, HW)        # pure metadata reshape (NCHW is channel-major)

    def full_spec(arr):
        shape = arr.shape
        return pl.BlockSpec(shape, lambda b, _s=shape: tuple(0 for _ in _s))

    grid_spec = pltpu.PrefetchScalarGridSpec(
        num_scalar_prefetch=0,
        grid=(nblk,),
        in_specs=[
            pl.BlockSpec((batch_block, Cin, HW), lambda b: (b, 0, 0)),
            full_spec(kp["w1"]), full_spec(kp["wdw"]), full_spec(kp["b_hid"]),
            full_spec(kp["w_fc1"]), full_spec(kp["b_fc1"]), full_spec(kp["w_fc2"]),
            full_spec(kp["w3"]), full_spec(kp["b3"]),
        ],
        out_specs=pl.BlockSpec((batch_block, Cout, HW), lambda b: (b, 0, 0)),
    )

    out = pl.pallas_call(
        functools.partial(mobile_bottleneck_kernel,
                          H=H, W=W, roll_sign=roll_sign, identity=identity),
        out_shape=jax.ShapeDtypeStruct((B, Cout, HW), jnp.float32),
        grid_spec=grid_spec,
        compiler_params=pltpu.CompilerParams(dimension_semantics=("parallel",)),
        cost_estimate=_cost_estimate(kp, B, Cin, HW, Cout),
    )(x_flat, kp["w1"], kp["wdw"], kp["b_hid"], kp["w_fc1"], kp["b_fc1"],
      kp["w_fc2"], kp["w3"], kp["b3"])

    return out.reshape(B, Cout, H, W)     # metadata reshape only


# ---------------------------------------------------------------------------------------
# Pure-JAX reference (NCHW, same math) for the correctness check.
# ---------------------------------------------------------------------------------------
def reference_forward(x, p):
    B, Cin, H, W = x.shape

    def hswish(v):
        return v * (jax.nn.relu(v + 3.0) / 6.0)

    h = jnp.einsum("oc,bchw->bohw", p["w1"], x)
    h = h * p["bn1_scale"][None, :, None, None] + p["bn1_bias"][None, :, None, None]
    h = hswish(h)

    hp = jnp.pad(h, ((0, 0), (0, 0), (1, 1), (1, 1)))
    acc = jnp.zeros_like(h)
    for kh in range(3):
        for kw in range(3):
            acc = acc + hp[:, :, kh:kh + H, kw:kw + W] * p["w_dw"][None, :, kh, kw, None, None]
    h = acc * p["bn2_scale"][None, :, None, None] + p["bn2_bias"][None, :, None, None]

    se = jnp.mean(h, axis=(2, 3))                               # (B, Chid)
    se = jax.nn.relu(se @ p["w_fc1"].T + p["b_fc1"])
    se = jax.nn.sigmoid(se @ p["w_fc2"].T + p["b_fc2"])
    h = h * se[:, :, None, None]

    h = hswish(h)
    o = jnp.einsum("oc,bchw->bohw", p["w3"], h)
    o = o * p["bn3_scale"][None, :, None, None] + p["bn3_bias"][None, :, None, None]
    return x + o


def make_params(key, cin, chid, cout, cse):
    ks = jax.random.split(key, 8)
    eps = 1e-5

    def bn_fold(k, c):
        kg, kb, km, kv = jax.random.split(k, 4)
        gamma = 1.0 + 0.1 * jax.random.normal(kg, (c,), jnp.float32)
        beta = 0.1 * jax.random.normal(kb, (c,), jnp.float32)
        mean = 0.1 * jax.random.normal(km, (c,), jnp.float32)
        var = 0.5 + jnp.abs(jax.random.normal(kv, (c,), jnp.float32))
        scale = gamma / jnp.sqrt(var + eps)
        bias = beta - mean * scale
        return scale, bias

    bn1s, bn1b = bn_fold(ks[0], chid)
    bn2s, bn2b = bn_fold(ks[1], chid)
    bn3s, bn3b = bn_fold(ks[2], cout)

    return {
        "w1": 0.1 * jax.random.normal(ks[3], (chid, cin), jnp.float32),
        "bn1_scale": bn1s, "bn1_bias": bn1b,
        "w_dw": 0.1 * jax.random.normal(ks[4], (chid, 3, 3), jnp.float32),
        "bn2_scale": bn2s, "bn2_bias": bn2b,
        "w_fc1": 0.1 * jax.random.normal(ks[5], (cse, chid), jnp.float32),
        "b_fc1": 0.01 * jnp.ones((cse,), jnp.float32),
        "w_fc2": 0.1 * jax.random.normal(ks[6], (chid, cse), jnp.float32),
        "b_fc2": 0.01 * jnp.ones((chid,), jnp.float32),
        "w3": 0.1 * jax.random.normal(ks[7], (cout, chid), jnp.float32),
        "bn3_scale": bn3s, "bn3_bias": bn3b,
    }


if __name__ == "__main__":
    B, H, W = 2, 16, 16
    Cin, Chid, Cout = 16, 32, 16
    Cse = make_divisible(Chid // 4, 8)    # = 8

    key = jax.random.PRNGKey(0)
    kx, kp_key = jax.random.split(key)
    x = jax.random.normal(kx, (B, Cin, H, W), jnp.float32)   # NCHW, like the PyTorch module
    params = make_params(kp_key, Cin, Chid, Cout, Cse)

    # Resolve the pltpu.roll convention once (outside jit), pick the batch-grid policy.
    roll_sign = _get_roll_sign()
    bblk = _default_batch_block(B)

    fwd = jax.jit(functools.partial(mobile_bottleneck, roll_sign=roll_sign, batch_block=bblk))
    ref = reference_forward(x, params)

    # f32 MXU path: strict check against the f32 reference.
    kp_f32 = prepare_kernel_params(params, jnp.float32)       # hoisted: folded once, reused
    out_f32 = jax.block_until_ready(fwd(x, kp_f32))
    np.testing.assert_allclose(np.asarray(out_f32), np.asarray(ref), rtol=1e-4, atol=1e-4)

    # bf16 MXU-operand path (v6e/v7x fast path, f32 accumulation): looser check.
    kp_bf16 = prepare_kernel_params(params, jnp.bfloat16)
    out_bf16 = jax.block_until_ready(fwd(x, kp_bf16))
    np.testing.assert_allclose(np.asarray(out_bf16), np.asarray(ref), rtol=2e-2, atol=2e-2)

    print("KERNEL_OK")
</pallas_src>

<mosaic_0001>
module attributes {stable_mosaic.version = 11 : i64} {
  func.func @_roll_probe_kernel(%arg0: memref<8x128xf32, #tpu.memory_space<vmem>>, %arg1: memref<8x128xf32, #tpu.memory_space<vmem>>) attributes {dimension_semantics = [], scalar_prefetch = 0 : i64, scratch_operands = 0 : i64, tpu.core_type = #tpu.core_type<tc>} {
    %c0 = arith.constant 0 : index
    %c0_0 = arith.constant 0 : index
    %0 = vector.load %arg0[%c0, %c0_0] : memref<8x128xf32, #tpu.memory_space<vmem>>, vector<8x128xf32>
    %c1_i32 = arith.constant 1 : i32
    %1 = tpu.dynamic_rotate %0 by %c1_i32 dim 1 : vector<8x128xf32>, i32 -> vector<8x128xf32>
    %c0_1 = arith.constant 0 : index
    %c0_2 = arith.constant 0 : index
    %2 = vector.load %arg1[%c0_1, %c0_2] : memref<8x128xf32, #tpu.memory_space<vmem>>, vector<8x128xf32>
    tpu.vector_store %arg1[%c0_1, %c0_2], %1 {strides = array<i32>} : memref<8x128xf32, #tpu.memory_space<vmem>>, vector<8x128xf32>,
    return
  }
}

</mosaic_0001>

<bundles_post_ra>
// kernel: tpu_custom_call.1
= control target key start
LH: loop header
LB: loop body
LE: loop exit
PB: predicated region body
PF: predicated region fallthrough
CT: control target
= control target key end

     0   :  { %6 = vsyncpa [#allocation3], 0  ;;  %s128_s0 = inlined_call_operand.hbm [shape: f32[8,128], index: 0, kind: input, shape index: {}]   ;;  %s129_s1 = inlined_call_operand.hbm [shape: f32[8,128], index: 1, kind: output, shape index: {}]  }
   0x1   :  { %7 = vsyncpa [#allocation4], 0  ;;  %s91_s6 = smov [#allocation2]   ;;  %s43_s10 = scalar_lea.hbm %s128_s0, 128 }
   0x2   :  { %s14_s7 = sshll.u32 %s91_s6, 4  ;;  %p44_p0 = scmp.ne.s32.totalorder %s128_s0, %s43_s10  ;;  %s15_s7 = int_to_ptr.vmem [resolvable:$true] %s14_s7 }
   0x3   :  { %p47_p1 = scmp.lt.u32.totalorder %s43_s10, %s128_s0 }
   0x5   :  { %p49_p2 = pnand %p47_p1, %p44_p0 }
   0x7   :  { %52 = shalt.err (!%p49_p2)
}
   0x8   :  { %s53_s15 = scalar_lea.vmem %s15_s7, 128  ;;  %p58_p4 = scmp.lt.s32.totalorder %s15_s7, %s15_s7 }
   0x9   :  { %p54_p3 = scmp.ne.s32.totalorder %s15_s7, %s53_s15  ;;  %p59_p5 = scmp.lt.s32.totalorder %s53_s15, %s53_s15 }
   0xb   :  { %p60_p6 = por %p59_p5, %p58_p4 }
   0xd   :  { %p61_p7 = pnand %p60_p6, %p54_p3 }
   0xf   :  { %64 = shalt.err (!%p61_p7)
}
  0x10   :  { %17 = dma.hbm_to_vmem [thread:$0]  %s128_s0, 128, %s15_s7, [#allocation3]  }
  0x11   :  { %87 = dma.done.wait [#allocation3], 128  }
  0x12   :  { %88 = vsyncadd [#allocation3], 4294967168  ;;  %v21_v0 = vld [vmem:[#allocation2] sm:$0xff]  ;;  %s92_s18 = smov 1   ;;  %s93_s19 = smov [#allocation5]  }
  0x13   :  { %22 = vrot.lane.b32.xlu0 %v21_v0, %s92_s18  ;;  %s31_s20 = sshll.u32 %s93_s19, 4  ;;  %s32_s20 = int_to_ptr.vmem [resolvable:$true] %s31_s20 }
  0x14   :  { %s65_s21 = scalar_lea.vmem %s32_s20, 128  ;;  %p70_p9 = scmp.lt.s32.totalorder %s32_s20, %s32_s20 }
  0x15   :  { %p66_p8 = scmp.ne.s32.totalorder %s32_s20, %s65_s21  ;;  %p71_p10 = scmp.lt.s32.totalorder %s65_s21, %s65_s21 }
  0x17   :  { %p72_p11 = por %p71_p10, %p70_p9 }
  0x19   :  { %p73_p12 = pnand %p72_p11, %p66_p8 }
  0x85   :  { %v23_v1 = vpop.permute.xlu0 %22 }
  0x86   :  { %24 = vst [vmem:[#allocation5] sm:$0xff] %v23_v1 }
  0x87   :  { %76 = shalt.err (!%p73_p12)
}
  0x88   :  { %s77_s0 = scalar_lea.hbm %s129_s1, 128 }
  0x89   :  { %p78_p13 = scmp.ne.s32.totalorder %s129_s1, %s77_s0  ;;  %p81_p0 = scmp.lt.u32.totalorder %s77_s0, %s129_s1 }
  0x8b   :  { %p83_p1 = pnand %p81_p0, %p78_p13 }
  0x8d   :  { %86 = shalt.err (!%p83_p1)
}
  0x8e   :  { %34 = dma.vmem_to_hbm [thread:$0]  %s32_s20, 128, %s129_s1, [#allocation4]  }
  0x8f   :  { %89 = dma.done.wait [#allocation4], 128  }
  0x90   :  { %90 = vsyncadd [#allocation4], 4294967168 }
  0x91   :  { %38 = vsyncpa [#allocation3], 1 }
  0x92   :  { %39 = vsyncpa [#allocation4], 1 }

</bundles_post_ra>
